<compile_context>
chip_gen: v7x
topology: tpu7x:2x2x1
jax: 0.10.0
libtpu: 0.0.40
codegen_flags: <defaults>
</compile_context>

<pallas_src>
import functools

import jax
import jax.numpy as jnp
from jax import lax
from jax.experimental import pallas as pl
from jax.experimental.pallas import tpu as pltpu


def _round_up(n, m):
    return ((n + m - 1) // m) * m


def _scale_norm_kernel(g_ref, x_ref, o_ref, *, inv_scale, inv_eps):
    # x_ref: (tile_rows, dim) block in VMEM; g_ref: (1,) scalar in SMEM.
    xf = x_ref[...].astype(jnp.float32)
    # Sum of squares over the feature (lane) axis, accumulated in f32.
    sq = jnp.sum(xf * xf, axis=-1, keepdims=True)
    # out = x * g * min(rsqrt(sum_sq) * sqrt(dim), 1/eps)
    #     == x / max(||x|| * dim**-0.5, eps) * g      (clamp folded into rsqrt)
    # rsqrt lands on the EUP (free slot for this HBM-bound kernel);
    # rsqrt(0) = inf is clamped to 1/eps, matching torch's clamp(min=eps).
    inv = jnp.minimum(lax.rsqrt(sq) * inv_scale, inv_eps) * g_ref[0]
    o_ref[...] = (xf * inv).astype(o_ref.dtype)


def _choose_tile_rows(rows, dim, dtype):
    """Byte/element-budgeted row tile.

    ~1M elements per block (4 MiB f32, 2 MiB bf16 native) keeps DMAs large
    enough that the ~0.35 us per-grid-step overhead is amortized even at v7x's
    3.2 TB/s, while the f32 intermediates plus double-buffered in/out blocks
    fit comfortably in a 32 MiB VMEM limit on all generations.
    """
    itemsize = jnp.dtype(dtype).itemsize
    sub = max(8, 32 // itemsize)          # native sublane packing: 8/16/32
    target_elems = 1 << 20                # ~4 MiB f32-equivalent working set
    tile = max(sub, (target_elems // max(dim, 1) // sub) * sub)
    # Keep >= ~4 grid steps when rows allow it, so the "parallel" axis can
    # shard across v7x's 2 TensorCores and the pipeline stays alive.
    rows_sub = _round_up(rows, sub)
    if rows_sub >= 4 * sub:
        tile = min(tile, max(sub, (rows_sub // 4 // sub) * sub))
    tile = min(tile, rows_sub)
    return max(tile, sub)


def scale_norm(x, g, eps=1e-4):
    """Pallas ScaleNorm. x: (..., dim). g: (1,) scalar parameter."""
    orig_shape = x.shape
    dim = orig_shape[-1]
    inv_scale = float(dim) ** 0.5         # 1 / (dim ** -0.5)

    rows = 1
    for s in orig_shape[:-1]:
        rows *= s
    x2 = x.reshape(rows, dim)

    tile_rows = _choose_tile_rows(rows, dim, x.dtype)
    grid = (pl.cdiv(rows, tile_rows),)    # partial last block is masked by Pallas

    kernel = functools.partial(_scale_norm_kernel,
                               inv_scale=inv_scale, inv_eps=1.0 / eps)

    out2 = pl.pallas_call(
        kernel,
        out_shape=jax.ShapeDtypeStruct((rows, dim), x.dtype),
        grid_spec=pltpu.PrefetchScalarGridSpec(
            num_scalar_prefetch=0,
            grid=grid,
            in_specs=[
                # g: tiny scalar parameter, lives in SMEM, untiled.
                pl.BlockSpec(memory_space=pltpu.MemorySpace.SMEM),
                # x: one (tile_rows, dim) block per grid step.  Block last dim
                # equals the full array extent, so dim need not be a multiple
                # of 128 (masked vst beats 4x traffic inflation from padding).
                pl.BlockSpec((tile_rows, dim), lambda i: (i, 0)),
            ],
            out_specs=pl.BlockSpec((tile_rows, dim), lambda i: (i, 0)),
        ),
        compiler_params=pltpu.CompilerParams(
            # Row axis is fully independent -> shards across v7x's 2 TCs.
            dimension_semantics=("parallel",),
            # Blocks are element-budgeted so double-buffered in+out plus f32
            # intermediates fit under 32 MiB on v5e (16 MiB default scoped),
            # v6e, and v7x (64 MiB physical).
            vmem_limit_bytes=32 * 1024 * 1024,
        ),
    )(g, x2)

    return out2.reshape(orig_shape)


def scale_norm_ref(x, g, eps=1e-4):
    """Pure-JAX reference mirroring the PyTorch forward (f32 math, final cast)."""
    dim = x.shape[-1]
    scale = dim ** (-0.5)
    xf = x.astype(jnp.float32)
    norm = jnp.sqrt(jnp.sum(xf * xf, axis=-1, keepdims=True)) * scale
    return (xf / jnp.maximum(norm, eps) * g[0]).astype(x.dtype)


if __name__ == "__main__":
    key = jax.random.PRNGKey(0)

    # Deterministic parameter init: ScaleNorm.__init__ sets g = torch.ones(1).
    g = jnp.ones((1,), dtype=jnp.float32)

    # 1) Small canonical shape (batch=2, seq=8, hidden=32).
    x = jax.random.normal(key, (2, 8, 32), dtype=jnp.float32)
    out = jax.block_until_ready(scale_norm(x, g))
    ref = scale_norm_ref(x, g)
    assert out.shape == x.shape
    assert jnp.allclose(out, ref, atol=2e-5, rtol=2e-5), "mismatch (f32 small)"

    # 2) Ragged rows (15), feature dim a multiple of 128 -> partial row block.
    x2 = jax.random.normal(jax.random.PRNGKey(1), (3, 5, 256), dtype=jnp.float32)
    out2 = jax.block_until_ready(scale_norm(x2, g))
    assert jnp.allclose(out2, scale_norm_ref(x2, g), atol=2e-5, rtol=2e-5), \
        "mismatch (f32 ragged rows)"

    # 3) dim=96 (not a multiple of 128) + ragged rows + multi-step grid
    #    -> exercises the un-padded lane path and masked partial stores.
    x3 = jax.random.normal(jax.random.PRNGKey(2), (4, 17, 96), dtype=jnp.float32)
    out3 = jax.block_until_ready(scale_norm(x3, g))
    assert jnp.allclose(out3, scale_norm_ref(x3, g), atol=2e-5, rtol=2e-5), \
        "mismatch (f32 dim%128!=0)"

    # 4) bf16 path -> exercises dtype-aware (16-row) sublane rounding.
    x4 = jax.random.normal(jax.random.PRNGKey(3), (2, 33, 128),
                           dtype=jnp.float32).astype(jnp.bfloat16)
    out4 = jax.block_until_ready(scale_norm(x4, g))
    assert jnp.allclose(out4.astype(jnp.float32),
                        scale_norm_ref(x4, g).astype(jnp.float32),
                        atol=2e-2, rtol=2e-2), "mismatch (bf16)"

    print("KERNEL_OK")
</pallas_src>

<mosaic_0001>
module attributes {stable_mosaic.version = 11 : i64} {
  func.func @_scale_norm_kernel(%arg0: i32, %arg1: memref<1xf32, #tpu.memory_space<smem>>, %arg2: memref<16x32xf32, #tpu.memory_space<vmem>>, %arg3: memref<16x32xf32, #tpu.memory_space<vmem>>) attributes {dimension_semantics = [#tpu.dimension_semantics<parallel>], iteration_bounds = array<i64: 1>, scalar_prefetch = 0 : i64, scratch_operands = 0 : i64, tpu.core_type = #tpu.core_type<tc>, window_params = [{transform_indices = @transform_0, window_bounds = array<i64: 1>}, {transform_indices = @transform_1, window_bounds = array<i64: 16, 32>}, {transform_indices = @transform_2, window_bounds = array<i64: 16, 32>}]} {
    %c0 = arith.constant 0 : index
    %c0_0 = arith.constant 0 : index
    %0 = vector.load %arg2[%c0, %c0_0] : memref<16x32xf32, #tpu.memory_space<vmem>>, vector<16x32xf32>
    %1 = arith.mulf %0, %0 : vector<16x32xf32>
    %cst = arith.constant dense<0.000000e+00> : vector<16xf32>
    %2 = vector.multi_reduction <add>, %1, %cst [1] : vector<16x32xf32> to vector<16xf32>
    %3 = vector.shape_cast %2 : vector<16xf32> to vector<16x1xf32>
    %4 = math.rsqrt %3 : vector<16x1xf32>
    %cst_1 = arith.constant 5.65685415 : f32
    %5 = vector.broadcast %cst_1 : f32 to vector<16x1xf32>
    %6 = arith.mulf %4, %5 : vector<16x1xf32>
    %cst_2 = arith.constant 1.000000e+04 : f32
    %7 = vector.broadcast %cst_2 : f32 to vector<16x1xf32>
    %8 = arith.minimumf %6, %7 : vector<16x1xf32>
    %c0_3 = arith.constant 0 : index
    %9 = memref.load %arg1[%c0_3] : memref<1xf32, #tpu.memory_space<smem>>
    %10 = vector.broadcast %9 : f32 to vector<16x1xf32>
    %11 = arith.mulf %8, %10 : vector<16x1xf32>
    %12 = vector.broadcast %11 : vector<16x1xf32> to vector<16x32xf32>
    %13 = arith.mulf %0, %12 : vector<16x32xf32>
    %c0_4 = arith.constant 0 : index
    %c0_5 = arith.constant 0 : index
    %14 = vector.load %arg3[%c0_4, %c0_5] : memref<16x32xf32, #tpu.memory_space<vmem>>, vector<16x32xf32>
    tpu.vector_store %arg3[%c0_4, %c0_5], %13 {strides = array<i32>} : memref<16x32xf32, #tpu.memory_space<vmem>>, vector<16x32xf32>,
    return
  }
  func.func @transform_0(%arg0: i32) -> i32 {
    %c0_i32 = arith.constant 0 : i32
    %c0_i32_0 = arith.constant 0 : i32
    return %c0_i32 : i32
  }
  func.func @transform_1(%arg0: i32) -> (i32, i32) {
    %c0_i32 = arith.constant 0 : i32
    %c0_i32_0 = arith.constant 0 : i32
    return %arg0, %c0_i32 : i32, i32
  }
  func.func @transform_2(%arg0: i32) -> (i32, i32) {
    %c0_i32 = arith.constant 0 : i32
    %c0_i32_0 = arith.constant 0 : i32
    return %arg0, %c0_i32 : i32, i32
  }
}

</mosaic_0001>

<bundles_post_ra>
// kernel: tpu_custom_call.1
= control target key start
LH: loop header
LB: loop body
LE: loop exit
PB: predicated region body
PF: predicated region fallthrough
CT: control target
= control target key end

     0   :  { %8 = vsyncpa [#allocation4], 0  ;;  %s181_s0 = inlined_call_operand.<no memory space> [shape: f32[1], index: 0, kind: input, shape index: {}]   ;;  %s182_s1 = inlined_call_operand.hbm [shape: f32[16,32], index: 1, kind: input, shape index: {}]   ;;  %s183_s2 = inlined_call_operand.hbm [shape: f32[16,32], index: 2, kind: output, shape index: {}]  }
   0x1   :  { %9 = vsyncpa [#allocation5], 0  ;;  %s125_s9 = smov [#allocation3]   ;;  %s77_s13 = scalar_lea.hbm %s182_s1, 256 }
   0x2   :  { %s17_s10 = sshll.u32 %s125_s9, 4  ;;  %p78_p0 = scmp.ne.s32.totalorder %s182_s1, %s77_s13  ;;  %s18_s10 = int_to_ptr.vmem [resolvable:$true] %s17_s10 }
   0x3   :  { %p81_p1 = scmp.lt.u32.totalorder %s77_s13, %s182_s1 }
   0x5   :  { %p83_p2 = pnand %p81_p1, %p78_p0 }
   0x7   :  { %86 = shalt.err (!%p83_p2)
}
   0x8   :  { %s87_s18 = scalar_lea.vmem %s18_s10, 256  ;;  %p92_p4 = scmp.lt.s32.totalorder %s18_s10, %s18_s10 }
   0x9   :  { %p88_p3 = scmp.ne.s32.totalorder %s18_s10, %s87_s18  ;;  %p93_p5 = scmp.lt.s32.totalorder %s87_s18, %s87_s18 }
   0xb   :  { %p94_p6 = por %p93_p5, %p92_p4 }
   0xd   :  { %p95_p7 = pnand %p94_p6, %p88_p3 }
   0xf   :  { %98 = shalt.err (!%p95_p7)
}
  0x10   :  { %s126_s19 = smov 128   ;;  %s127_s20 = smov 8  }
  0x11   :  { %23 = dma.hbm_to_vmem [thread:$0]  %s182_s1, 256, %s18_s10, [#allocation4], %s126_s19, %s126_s19, %s127_s20  }
  0x12   :  { %121 = dma.done.wait [#allocation4], 256  }
  0x13   :  { %122 = vsyncadd [#allocation4], 4294967040  ;;  %v27_v0 = vld [vmem:[#allocation3] sm:$0xff]  ;;  %vm31_vm0 = vcmask 261120   ;;  %v28_v1 = vld [vmem:[#allocation3 + $0x8] sm:$0xff]  ;;  %v45_v10 = vstv %s181_s0  ;;  %s128_s24 = smov [#allocation6]  }
  0x14   :  { %v29_v2 = vmul.f32 %v27_v0, %v27_v0  ;;  %v30_v3 = vmul.f32 %v28_v1, %v28_v1  ;;  %s57_s25 = sshll.u32 %s128_s24, 4  ;;  %s58_s25 = int_to_ptr.vmem [resolvable:$true] %s57_s25 }
  0x15   :  { %s99_s26 = scalar_lea.vmem %s58_s25, 256  ;;  %p104_p9 = scmp.lt.s32.totalorder %s58_s25, %s58_s25 }
  0x16   :  { %v32_v4 = vsel %vm31_vm0, %v29_v2, 0.0  ;;  %v35_v5 = vsel %vm31_vm0, %v30_v3, 0.0  ;;  %p100_p8 = scmp.ne.s32.totalorder %s58_s25, %s99_s26  ;;  %p105_p10 = scmp.lt.s32.totalorder %s99_s26, %s99_s26 }
  0x17   :  { %33 = vadd.xlane.f32.xlu0 %v32_v4 }
  0x18   :  { %p106_p11 = por %p105_p10, %p104_p9 }
  0x1a   :  { %p107_p12 = pnand %p106_p11, %p100_p8 }
  0x1b   :  { %36 = vadd.xlane.f32.xlu0 %v35_v5 }
  0xa4   :  { %v34_v6 = vpop.xlane.xlu0 %33 }
  0xa5   :  { %73 = vrsqrt.f32 %v34_v6 }
  0xa8   :  { %v37_v7 = vpop.xlane.xlu0 %36 }
  0xa9   :  { %75 = vrsqrt.f32 %v37_v7 }
  0xaf   :  { %v74_v8 = vpop.eup %73 }
  0xb0   :  { %v40_v9 = vmul.f32 5.656854, %v74_v8 }
  0xb2   :  { %v42_v11 = vmin.f32 %v40_v9, 10000.0 }
  0xb3   :  { %v76_v12 = vpop.eup %75 }
  0xb4   :  { %v46_v13 = vmul.f32 %v45_v10, %v42_v11  ;;  %v41_v14 = vmul.f32 5.656854, %v76_v12 }
  0xb6   :  { %v48_v15 = vmul.f32 %v46_v13, %v27_v0  ;;  %v43_v16 = vmin.f32 %v41_v14, 10000.0 }
  0xb8   :  { %50 = vst.msk [vmem:[#allocation6] sm:$0xff] %vm31_vm0, %v48_v15  ;;  %v47_v17 = vmul.f32 %v45_v10, %v43_v16 }
  0xba   :  { %v49_v18 = vmul.f32 %v47_v17, %v28_v1 }
  0xbc   :  { %51 = vst.msk [vmem:[#allocation6 + $0x8] sm:$0xff] %vm31_vm0, %v49_v18 }
  0xbd   :  { %110 = shalt.err (!%p107_p12)
}
  0xbe   :  { %s111_s28 = scalar_lea.hbm %s183_s2, 256 }
  0xbf   :  { %p112_p13 = scmp.ne.s32.totalorder %s183_s2, %s111_s28  ;;  %p115_p0 = scmp.lt.u32.totalorder %s111_s28, %s183_s2 }
  0xc1   :  { %p117_p1 = pnand %p115_p0, %p112_p13 }
  0xc3   :  { %120 = shalt.err (!%p117_p1)
}
  0xc4   :  { %63 = dma.vmem_to_hbm [thread:$0]  %s58_s25, 256, %s183_s2, [#allocation5], %s126_s19, %s126_s19, %s127_s20  }
  0xc5   :  { %123 = dma.done.wait [#allocation5], 256  }
  0xc6   :  { %124 = vsyncadd [#allocation5], 4294967040 }
  0xc7   :  { %67 = vsyncpa [#allocation4], 1 }
  0xc8   :  { %68 = vsyncpa [#allocation5], 1 }

</bundles_post_ra>
